<compile_context>
chip_gen: v5e
topology: v5e:2x2
jax: 0.10.0
libtpu: 0.0.40
codegen_flags: <defaults>
</compile_context>

<pallas_src>
import math

import jax
import jax.numpy as jnp
from jax.experimental import pallas as pl
from jax.experimental.pallas import tpu as pltpu


def _bda_kernel(h_ref, mask_ref, htm1_ref,
                vwT_ref, wawT_ref, bias_ref, vvec_ref, c_ref,
                z_ref, beta_ref):
    # Per grid-step block shapes:
    #   h_ref    : (TB, T, D_in)   bf16 (or f32)
    #   mask_ref : (TB, T)         f32, lane-dense
    #   htm1_ref : (TB, D_out)     f32
    #   vwT_ref  : (D_in, D_out)   V.weight pre-transposed (bf16/f32)
    #   wawT_ref : (D_out, D_out)  W_a.weight pre-transposed (f32)
    #   bias_ref : (1, D_out)      V.bias + W_a.bias folded
    #   vvec_ref : (1, D_out)
    #   c_ref    : (1, 1) scalar in SMEM
    #   z_ref    : (TB, D_in)      lane-dense output slab
    #   beta_ref : (TB, T)         lane-dense output slab
    TB, T, D_in = h_ref.shape
    D_out = vwT_ref.shape[1]

    H3 = h_ref[...]                                     # (TB, T, D_in)
    # NOTE: tile-exact when T % 8 == 0; otherwise a (correct) relayout copy.
    Hf = H3.reshape(TB * T, D_in)

    # One large MXU matmul for V over all TB*T rows, f32 accumulation.
    Fk = jnp.dot(Hf, vwT_ref[...],
                 preferred_element_type=jnp.float32)    # (TB*T, D_out)

    # W_a matmul for the whole batch block + folded (V.bias + W_a.bias).
    Fk_prime = (jnp.dot(htm1_ref[...], wawT_ref[...],
                        preferred_element_type=jnp.float32)
                + bias_ref[...])                        # (TB, D_out)

    # Broadcast-add Fk_prime over the T timesteps of each batch row.
    Fk3 = jnp.tanh(Fk.reshape(TB, T, D_out) + Fk_prime[:, None, :])

    # beta scores: VPU multiply + lane reduce over D_out (tiny contraction,
    # kept off the MXU).
    s = jnp.sum(Fk3 * vvec_ref[...], axis=-1) + c_ref[0, 0]          # (TB, T)

    # Masked softmax over the time axis (matches PyTorch masked_softmax).
    m = mask_ref[...]                                                # (TB, T)
    x = jnp.clip(s, -15.0, 15.0) * m
    e_x = jnp.exp(x - jnp.max(x, axis=-1, keepdims=True)) * m
    denom = jnp.sum(e_x, axis=-1, keepdims=True) + 1e-6
    beta = e_x * pl.reciprocal(denom, approx=False)                  # (TB, T)

    # z = beta @ H_r : broadcast multiply + cross-sublane reduce over T
    # (K = T is tiny; keep it on VPU/XLU in f32).
    z = jnp.sum(beta[:, :, None] * H3.astype(jnp.float32), axis=1)   # (TB, D_in)

    z_ref[...] = z.astype(z_ref.dtype)
    beta_ref[...] = beta.astype(beta_ref.dtype)


def _round_up(x, m):
    return ((x + m - 1) // m) * m


def boundary_decoder_attention(H_r, mask_r, h_tm1, params, *,
                               tb=None, matmul_dtype=jnp.bfloat16):
    """Pallas implementation of BoundaryDecoderAttention.forward (noisy_net=False)."""
    B, T, D_in = H_r.shape
    D_out = params["V_w"].shape[0]
    itemsize = jnp.dtype(matmul_dtype).itemsize

    if tb is None:
        # Size the H_r block by DMA volume (~1 MiB/step) and MXU row fill
        # (TB*T >= 256), never below 8 sublanes, never tb=1.
        tb_bytes = max(1, (1 << 20) // max(1, T * D_in * itemsize))
        tb_rows = pl.cdiv(256, T)
        b_ceil = _round_up(B, 8)
        tb = max(8, min(max(tb_bytes, tb_rows), b_ceil))
        if b_ceil >= 16:
            # Keep >= 2 grid steps so ("parallel",) shards across v7x's 2 TCs.
            tb = min(tb, _round_up(pl.cdiv(b_ceil, 2), 8))
        tb = _round_up(tb, 8)

    # Pad the batch up to a multiple of tb; padded rows are fully masked.
    B_pad = _round_up(B, tb)
    pad = B_pad - B
    if pad:
        H_r = jnp.pad(H_r, ((0, pad), (0, 0), (0, 0)))
        mask_r = jnp.pad(mask_r, ((0, pad), (0, 0)))
        h_tm1 = jnp.pad(h_tm1, ((0, pad), (0, 0)))

    # Glue: cast big operands for the MXU, pre-transpose weights, fold biases.
    H_in = H_r.astype(matmul_dtype)
    V_wT = params["V_w"].T.astype(matmul_dtype)              # (D_in, D_out)
    Wa_wT = params["Wa_w"].T.astype(jnp.float32)             # small: keep exact
    htm1_in = h_tm1.astype(jnp.float32)
    bias = (params["V_b"] + params["Wa_b"]).astype(jnp.float32).reshape(1, D_out)
    v_vec = params["v"].astype(jnp.float32).reshape(1, D_out)
    c = params["c"].astype(jnp.float32).reshape(1, 1)
    mask2 = mask_r.astype(jnp.float32)                       # (B_pad, T) lane-dense

    # Scoped-VMEM budget: double-buffered blocks + (still double-buffered)
    # constants + compiler scratch headroom.  Only raise the limit when the
    # smallest default (v5e: 16 MiB) would be exceeded.
    def _bytes(shape, dt):
        return math.prod(shape) * jnp.dtype(dt).itemsize

    blocks = 2 * (_bytes((tb, T, D_in), matmul_dtype)
                  + _bytes((tb, T), jnp.float32)
                  + _bytes((tb, D_out), jnp.float32)
                  + _bytes((tb, D_in), jnp.float32)
                  + _bytes((tb, T), jnp.float32))
    consts = 2 * (_bytes((D_in, D_out), matmul_dtype)
                  + _bytes((D_out, D_out), jnp.float32)
                  + 2 * _bytes((1, D_out), jnp.float32))
    est_vmem = blocks + consts + (4 << 20)
    vmem_limit = est_vmem if est_vmem > (16 << 20) else None

    grid_spec = pltpu.PrefetchScalarGridSpec(
        num_scalar_prefetch=0,
        grid=(B_pad // tb,),
        in_specs=[
            pl.BlockSpec((tb, T, D_in), lambda b: (b, 0, 0)),   # H_r
            pl.BlockSpec((tb, T), lambda b: (b, 0)),            # mask (lane-dense)
            pl.BlockSpec((tb, D_out), lambda b: (b, 0)),        # h_tm1
            pl.BlockSpec((D_in, D_out), lambda b: (0, 0)),      # V_wT (constant)
            pl.BlockSpec((D_out, D_out), lambda b: (0, 0)),     # Wa_wT (constant)
            pl.BlockSpec((1, D_out), lambda b: (0, 0)),         # folded bias
            pl.BlockSpec((1, D_out), lambda b: (0, 0)),         # v
            pl.BlockSpec(memory_space=pltpu.MemorySpace.SMEM),  # c scalar
        ],
        out_specs=[
            pl.BlockSpec((tb, D_in), lambda b: (b, 0)),         # z  (lane-dense 2-D)
            pl.BlockSpec((tb, T), lambda b: (b, 0)),            # beta (lane-dense 2-D)
        ],
    )

    z, beta = pl.pallas_call(
        _bda_kernel,
        out_shape=(
            jax.ShapeDtypeStruct((B_pad, D_in), jnp.float32),
            jax.ShapeDtypeStruct((B_pad, T), jnp.float32),
        ),
        grid_spec=grid_spec,
        compiler_params=pltpu.CompilerParams(
            dimension_semantics=("parallel",),
            vmem_limit_bytes=vmem_limit),
    )(H_in, mask2, htm1_in, V_wT, Wa_wT, bias, v_vec, c)

    return z[:B], beta[:B]


def _reference(H_r, mask_r, h_tm1, params):
    """Pure-JAX reference mirroring the PyTorch forward."""
    Fk = jnp.einsum("btd,od->bto", H_r, params["V_w"]) + params["V_b"]
    Fk_prime = h_tm1 @ params["Wa_w"].T + params["Wa_b"]
    Fk = jnp.tanh(Fk + Fk_prime[:, None, :])
    beta = Fk @ params["v"] + params["c"]
    x = jnp.clip(beta, -15.0, 15.0) * mask_r
    e_x = jnp.exp(x - jnp.max(x, axis=-1, keepdims=True)) * mask_r
    beta = e_x / (jnp.sum(e_x, axis=-1, keepdims=True) + 1e-6)
    z = jnp.einsum("bt,btd->bd", beta, H_r)
    return z, beta


def _init_params(key, input_dim, output_dim):
    k1, k2, k3 = jax.random.split(key, 3)
    lim_v = math.sqrt(6.0 / (input_dim + output_dim))
    V_w = jax.random.uniform(k1, (output_dim, input_dim), jnp.float32, -lim_v, lim_v)
    lim_w = math.sqrt(6.0 / (output_dim + output_dim))
    Wa_w = jax.random.uniform(k2, (output_dim, output_dim), jnp.float32, -lim_w, lim_w)
    return {
        "V_w": V_w,
        "V_b": jnp.zeros((output_dim,), jnp.float32),
        "Wa_w": Wa_w,
        "Wa_b": jnp.zeros((output_dim,), jnp.float32),
        "v": 0.05 * jax.random.normal(k3, (output_dim,), jnp.float32),
        "c": jnp.ones((1,), jnp.float32),
    }


if __name__ == "__main__":
    B, T, D_in, D_out = 16, 8, 32, 32   # small shapes; tb=8 -> 2 parallel grid steps

    key = jax.random.PRNGKey(0)
    kH, kh, kp = jax.random.split(key, 3)

    H_r = jax.random.normal(kH, (B, T, D_in), jnp.float32)
    h_tm1 = jax.random.normal(kh, (B, D_out), jnp.float32)
    # Varying valid lengths per batch element (1..T).
    lengths = (jnp.arange(B) % T) + 1
    mask_r = (jnp.arange(T)[None, :] < lengths[:, None]).astype(jnp.float32)

    params = _init_params(kp, D_in, D_out)
    z_ref, beta_ref = _reference(H_r, mask_r, h_tm1, params)

    # 1) Exact-semantics check: f32 matmul path, tight tolerance.
    z32, beta32 = boundary_decoder_attention(H_r, mask_r, h_tm1, params,
                                             matmul_dtype=jnp.float32)
    jax.block_until_ready((z32, beta32))
    assert jnp.allclose(z32, z_ref, atol=2e-5, rtol=2e-5)
    assert jnp.allclose(beta32, beta_ref, atol=2e-5, rtol=2e-5)

    # 2) Default perf path: bf16 DMA/matmul operands, f32 accumulation.
    z, beta = boundary_decoder_attention(H_r, mask_r, h_tm1, params)
    jax.block_until_ready((z, beta))
    assert jnp.allclose(z, z_ref, atol=5e-2, rtol=5e-2)
    assert jnp.allclose(beta, beta_ref, atol=5e-2, rtol=5e-2)

    print("KERNEL_OK")
</pallas_src>

<mosaic_0001>
module attributes {stable_mosaic.version = 11 : i64} {
  func.func @_bda_kernel(%arg0: i32, %arg1: memref<8x8x32xf32, #tpu.memory_space<vmem>>, %arg2: memref<8x8xf32, #tpu.memory_space<vmem>>, %arg3: memref<8x32xf32, #tpu.memory_space<vmem>>, %arg4: memref<32x32xf32, #tpu.memory_space<vmem>>, %arg5: memref<32x32xf32, #tpu.memory_space<vmem>>, %arg6: memref<1x32xf32, #tpu.memory_space<vmem>>, %arg7: memref<1x32xf32, #tpu.memory_space<vmem>>, %arg8: memref<1x1xf32, #tpu.memory_space<smem>>, %arg9: memref<8x32xf32, #tpu.memory_space<vmem>>, %arg10: memref<8x8xf32, #tpu.memory_space<vmem>>) attributes {dimension_semantics = [#tpu.dimension_semantics<parallel>], iteration_bounds = array<i64: 2>, scalar_prefetch = 0 : i64, scratch_operands = 0 : i64, tpu.core_type = #tpu.core_type<tc>, window_params = [{transform_indices = @transform_0, window_bounds = array<i64: 8, 8, 32>}, {transform_indices = @transform_1, window_bounds = array<i64: 8, 8>}, {transform_indices = @transform_2, window_bounds = array<i64: 8, 32>}, {pipeline_mode = #tpu.pipeline_mode<synchronous>, transform_indices = @transform_3, window_bounds = array<i64: 32, 32>}, {pipeline_mode = #tpu.pipeline_mode<synchronous>, transform_indices = @transform_4, window_bounds = array<i64: 32, 32>}, {pipeline_mode = #tpu.pipeline_mode<synchronous>, transform_indices = @transform_5, window_bounds = array<i64: 1, 32>}, {pipeline_mode = #tpu.pipeline_mode<synchronous>, transform_indices = @transform_6, window_bounds = array<i64: 1, 32>}, {transform_indices = @transform_7, window_bounds = array<i64: 1, 1>}, {transform_indices = @transform_8, window_bounds = array<i64: 8, 32>}, {transform_indices = @transform_9, window_bounds = array<i64: 8, 8>}]} {
    %c0 = arith.constant 0 : index
    %c0_0 = arith.constant 0 : index
    %c0_1 = arith.constant 0 : index
    %0 = vector.load %arg1[%c0, %c0_0, %c0_1] : memref<8x8x32xf32, #tpu.memory_space<vmem>>, vector<8x8x32xf32>
    %1 = vector.shape_cast %0 : vector<8x8x32xf32> to vector<64x32xf32>
    %c0_2 = arith.constant 0 : index
    %c0_3 = arith.constant 0 : index
    %2 = vector.load %arg4[%c0_2, %c0_3] : memref<32x32xf32, #tpu.memory_space<vmem>>, vector<32x32xf32>
    %cst = arith.constant dense<0.000000e+00> : vector<64x32xf32>
    %3 = tpu.matmul %1, %2, %cst {dimension_numbers = #tpu.dot_dimension_numbers<[1], [0], [0], [1], [0, 0, 1, 1], [], []>} : vector<64x32xf32>, vector<32x32xf32>, vector<64x32xf32> -> vector<64x32xf32>
    %c0_4 = arith.constant 0 : index
    %c0_5 = arith.constant 0 : index
    %4 = vector.load %arg3[%c0_4, %c0_5] : memref<8x32xf32, #tpu.memory_space<vmem>>, vector<8x32xf32>
    %c0_6 = arith.constant 0 : index
    %c0_7 = arith.constant 0 : index
    %5 = vector.load %arg5[%c0_6, %c0_7] : memref<32x32xf32, #tpu.memory_space<vmem>>, vector<32x32xf32>
    %cst_8 = arith.constant dense<0.000000e+00> : vector<8x32xf32>
    %6 = tpu.matmul %4, %5, %cst_8 {dimension_numbers = #tpu.dot_dimension_numbers<[1], [0], [0], [1], [0, 0, 1, 1], [], []>} : vector<8x32xf32>, vector<32x32xf32>, vector<8x32xf32> -> vector<8x32xf32>
    %c0_9 = arith.constant 0 : index
    %c0_10 = arith.constant 0 : index
    %7 = vector.load %arg6[%c0_9, %c0_10] : memref<1x32xf32, #tpu.memory_space<vmem>>, vector<1x32xf32>
    %8 = vector.broadcast %7 : vector<1x32xf32> to vector<8x32xf32>
    %9 = arith.addf %6, %8 : vector<8x32xf32>
    %10 = vector.shape_cast %3 : vector<64x32xf32> to vector<8x8x32xf32>
    %11 = vector.shape_cast %9 : vector<8x32xf32> to vector<8x1x32xf32>
    %12 = vector.broadcast %11 : vector<8x1x32xf32> to vector<8x8x32xf32>
    %13 = arith.addf %10, %12 : vector<8x8x32xf32>
    %14 = math.tanh %13 : vector<8x8x32xf32>
    %c0_11 = arith.constant 0 : index
    %c0_12 = arith.constant 0 : index
    %15 = vector.load %arg7[%c0_11, %c0_12] : memref<1x32xf32, #tpu.memory_space<vmem>>, vector<1x32xf32>
    %16 = vector.shape_cast %15 : vector<1x32xf32> to vector<1x1x32xf32>
    %17 = vector.broadcast %16 : vector<1x1x32xf32> to vector<8x8x32xf32>
    %18 = arith.mulf %14, %17 : vector<8x8x32xf32>
    %cst_13 = arith.constant dense<0.000000e+00> : vector<8x8xf32>
    %19 = vector.multi_reduction <add>, %18, %cst_13 [2] : vector<8x8x32xf32> to vector<8x8xf32>
    %c0_14 = arith.constant 0 : index
    %c0_15 = arith.constant 0 : index
    %20 = memref.load %arg8[%c0_14, %c0_15] : memref<1x1xf32, #tpu.memory_space<smem>>
    %21 = vector.broadcast %20 : f32 to vector<8x8xf32>
    %22 = arith.addf %19, %21 : vector<8x8xf32>
    %c0_16 = arith.constant 0 : index
    %c0_17 = arith.constant 0 : index
    %23 = vector.load %arg2[%c0_16, %c0_17] : memref<8x8xf32, #tpu.memory_space<vmem>>, vector<8x8xf32>
    %cst_18 = arith.constant -1.500000e+01 : f32
    %cst_19 = arith.constant 1.500000e+01 : f32
    %24 = vector.broadcast %cst_18 : f32 to vector<8x8xf32>
    %25 = arith.maximumf %24, %22 : vector<8x8xf32>
    %26 = vector.broadcast %cst_19 : f32 to vector<8x8xf32>
    %27 = arith.minimumf %26, %25 : vector<8x8xf32>
    %28 = arith.mulf %27, %23 : vector<8x8xf32>
    %cst_20 = arith.constant dense<0xFF800000> : vector<8xf32>
    %29 = vector.multi_reduction <maximumf>, %28, %cst_20 [1] : vector<8x8xf32> to vector<8xf32>
    %30 = vector.shape_cast %29 : vector<8xf32> to vector<8x1xf32>
    %31 = vector.broadcast %30 : vector<8x1xf32> to vector<8x8xf32>
    %32 = arith.subf %28, %31 : vector<8x8xf32>
    %33 = math.exp %32 : vector<8x8xf32>
    %34 = arith.mulf %33, %23 : vector<8x8xf32>
    %cst_21 = arith.constant dense<0.000000e+00> : vector<8xf32>
    %35 = vector.multi_reduction <add>, %34, %cst_21 [1] : vector<8x8xf32> to vector<8xf32>
    %36 = vector.shape_cast %35 : vector<8xf32> to vector<8x1xf32>
    %cst_22 = arith.constant 9.99999997E-7 : f32
    %37 = vector.broadcast %cst_22 : f32 to vector<8x1xf32>
    %38 = arith.addf %36, %37 : vector<8x1xf32>
    %39 = tpu.reciprocal %38 : vector<8x1xf32> -> vector<8x1xf32>
    %40 = vector.broadcast %39 : vector<8x1xf32> to vector<8x8xf32>
    %41 = arith.mulf %34, %40 : vector<8x8xf32>
    %42 = vector.shape_cast %41 : vector<8x8xf32> to vector<8x8x1xf32>
    %43 = vector.broadcast %42 : vector<8x8x1xf32> to vector<8x8x32xf32>
    %44 = arith.mulf %43, %0 : vector<8x8x32xf32>
    %cst_23 = arith.constant dense<0.000000e+00> : vector<8x32xf32>
    %45 = vector.multi_reduction <add>, %44, %cst_23 [1] : vector<8x8x32xf32> to vector<8x32xf32>
    %c0_24 = arith.constant 0 : index
    %c0_25 = arith.constant 0 : index
    %46 = vector.load %arg9[%c0_24, %c0_25] : memref<8x32xf32, #tpu.memory_space<vmem>>, vector<8x32xf32>
    tpu.vector_store %arg9[%c0_24, %c0_25], %45 {strides = array<i32>} : memref<8x32xf32, #tpu.memory_space<vmem>>, vector<8x32xf32>,
    %c0_26 = arith.constant 0 : index
    %c0_27 = arith.constant 0 : index
    %47 = vector.load %arg10[%c0_26, %c0_27] : memref<8x8xf32, #tpu.memory_space<vmem>>, vector<8x8xf32>
    tpu.vector_store %arg10[%c0_26, %c0_27], %41 {strides = array<i32>} : memref<8x8xf32, #tpu.memory_space<vmem>>, vector<8x8xf32>,
    return
  }
  func.func @transform_0(%arg0: i32) -> (i32, i32, i32) {
    %c0_i32 = arith.constant 0 : i32
    %c0_i32_0 = arith.constant 0 : i32
    %c0_i32_1 = arith.constant 0 : i32
    return %arg0, %c0_i32, %c0_i32_0 : i32, i32, i32
  }
  func.func @transform_1(%arg0: i32) -> (i32, i32) {
    %c0_i32 = arith.constant 0 : i32
    %c0_i32_0 = arith.constant 0 : i32
    return %arg0, %c0_i32 : i32, i32
  }
  func.func @transform_2(%arg0: i32) -> (i32, i32) {
    %c0_i32 = arith.constant 0 : i32
    %c0_i32_0 = arith.constant 0 : i32
    return %arg0, %c0_i32 : i32, i32
  }
  func.func @transform_3(%arg0: i32) -> (i32, i32) {
    %c0_i32 = arith.constant 0 : i32
    %c0_i32_0 = arith.constant 0 : i32
    %c0_i32_1 = arith.constant 0 : i32
    return %c0_i32, %c0_i32_0 : i32, i32
  }
  func.func @transform_4(%arg0: i32) -> (i32, i32) {
    %c0_i32 = arith.constant 0 : i32
    %c0_i32_0 = arith.constant 0 : i32
    %c0_i32_1 = arith.constant 0 : i32
    return %c0_i32, %c0_i32_0 : i32, i32
  }
  func.func @transform_5(%arg0: i32) -> (i32, i32) {
    %c0_i32 = arith.constant 0 : i32
    %c0_i32_0 = arith.constant 0 : i32
    %c0_i32_1 = arith.constant 0 : i32
    return %c0_i32, %c0_i32_0 : i32, i32
  }
  func.func @transform_6(%arg0: i32) -> (i32, i32) {
    %c0_i32 = arith.constant 0 : i32
    %c0_i32_0 = arith.constant 0 : i32
    %c0_i32_1 = arith.constant 0 : i32
    return %c0_i32, %c0_i32_0 : i32, i32
  }
  func.func @transform_7(%arg0: i32) -> (i32, i32) {
    %c0_i32 = arith.constant 0 : i32
    %c0_i32_0 = arith.constant 0 : i32
    %c0_i32_1 = arith.constant 0 : i32
    return %c0_i32, %c0_i32_0 : i32, i32
  }
  func.func @transform_8(%arg0: i32) -> (i32, i32) {
    %c0_i32 = arith.constant 0 : i32
    %c0_i32_0 = arith.constant 0 : i32
    return %arg0, %c0_i32 : i32, i32
  }
  func.func @transform_9(%arg0: i32) -> (i32, i32) {
    %c0_i32 = arith.constant 0 : i32
    %c0_i32_0 = arith.constant 0 : i32
    return %arg0, %c0_i32 : i32, i32
  }
}

</mosaic_0001>

<bundles_post_ra>
// kernel: tpu_custom_call.1
= control target key start
LH: loop header
LB: loop body
LE: loop exit
PB: predicated region body
PF: predicated region fallthrough
CT: control target
= control target key end

     0   :  { %s1984_s0 = inlined_call_operand.hbm [shape: f32[16,8,32], index: 0, kind: input, shape index: {}]   ;;  %s1985_s1 = inlined_call_operand.vmem [shape: f32[16,8], index: 1, kind: input, shape index: {}]   ;;  %s1986_s2 = inlined_call_operand.vmem [shape: f32[16,32], index: 2, kind: input, shape index: {}]   ;;  %s1987_s3 = inlined_call_operand.hbm [shape: f32[32,32], index: 3, kind: input, shape index: {}]   ;;  %s1988_s4 = inlined_call_operand.hbm [shape: f32[32,32], index: 4, kind: input, shape index: {}]   ;;  %s1989_s5 = inlined_call_operand.vmem [shape: f32[1,32], index: 5, kind: input, shape index: {}]   ;;  %s1990_s6 = inlined_call_operand.vmem [shape: f32[1,32], index: 6, kind: input, shape index: {}]   ;;  %s1991_s7 = inlined_call_operand.<no memory space> [shape: f32[1,1], index: 7, kind: input, shape index: {}]   ;;  %s1992_s8 = inlined_call_operand.hbm [shape: f32[16,32], index: 8, kind: output, shape index: {0}]   ;;  %s1993_s9 = inlined_call_operand.vmem [shape: f32[16,8], index: 9, kind: output, shape index: {1}]  }
   0x1   :  { %1996 = sst [smem:[#allocation13_spill]] %s1987_s3 }
   0x2   :  { %1997 = sst [smem:[#allocation14_spill]] %s1988_s4 }
   0x3   :  { %15 = sst [smem:[#allocation2]] %s1991_s7 }
   0x4   :  { %16 = vsyncpa [#allocation4], 0 }
   0x5   :  { %18 = vsyncpa [#allocation4 + $0x1], 0 }
   0x6   :  { %19 = vsyncpa [#allocation7], 0 }
   0x7   :  { %20 = vsyncpa [#allocation5], 0 }
   0x8   :  { %22 = vsyncpa [#allocation5 + $0x1], 0  ;;  %s1596_s11 = smov 0   ;;  %s1598_s12 = smov 0  }
   0x9   :  { %s1600_s13 = smov 0   ;;  %s1602_s14 = smov 0  }
   0xa LB: > { %s1617_s7 = sadd.s32 4294967295, %s1536_s14   ;;  %s1218_s15 = sadd.s32 4294967294, %s1536_s14   ;;  %s1536_s14 = sphi %s1602_s14, %s2011_s14   ;;  %s1532_s13 = sphi %s1600_s13, %s2010_s13   ;;  %s1528_s12 = sphi %s1598_s12, %s2009_s12   ;;  %s1524_s11 = sphi %s1596_s11, %s2008_s11  }
   0xb   : > { %p48_p0 = scmp.ne.s32.totalorder %s1528_s12, %s1524_s11  ;;  %p49_p1 = scmp.eq.s32.totalorder %s1617_s7, 0 }
   0xc   : > { %p229_p2 = scmp.eq.s32.totalorder %s1617_s7, 1  ;;  %p235_p3 = scmp.eq.s32.totalorder %s1218_s15, 1 }
   0xd   : > { %p1626_p4 = por %p49_p1, %p48_p0  ;;  %p1219_p5 = scmp.ge.s32.totalorder %s1536_s14, 1 }
   0xe   : > { %p1631_p6 = por %p235_p3, %p48_p0  ;;  %p268_p7 = scmp.lt.s32.totalorder %s1536_s14, 3 }
   0xf   : > { %s2000_s3 = sld [smem:[#allocation13_spill]]  ;;  %s1538_s22 = smov [#allocation6]  }
  0x10   : > { %p1639_p8 = pnand %p1219_p5, %p268_p7  ;;  %s281_s23 = sshll.u32 %s1538_s22, 4  ;;  %s282_s23 = int_to_ptr.vmem [resolvable:$true] %s281_s23 }
  0x11   : > { %s2002_s4 = sld [smem:[#allocation14_spill]]  ;;  %s1994_s27 = smov 128  }
  0x12   : > { %p1276_p9 = pneg %p1639_p8  ;;  %s1995_s28 = smov 8  }
  0x13   : > { %s1541_s29 = smov [#allocation8]   ;;  %s1658_s10 = sadd.s32 1, %s1536_s14  }
  0x14   : > { %p1277_p10 = pnand %p1276_p9, %p49_p1  ;;  %s295_s30 = sshll.u32 %s1541_s29, 4  ;;  %s296_s30 = int_to_ptr.vmem [resolvable:$true] %s295_s30 }
  0x15   : > { %s279_s20 = sshll.u32 %s2000_s3, 4  ;;  %s35_s15 = sadd.s32 1, %s1532_s13  ;;  %s280_s20 = int_to_ptr.hbm [resolvable:$true] %s279_s20 }
  0x16   : > { %1279 = dma.hbm_to_vmem [thread:$0]  (!%p1277_p10), %s280_s20, 512, %s282_s23, [#allocation7], %s1994_s27, %s1994_s27, %s1995_s28  }
  0x17   : > { %s293_s26 = sshll.u32 %s2002_s4, 4  ;;  %s32_s18 = ssub.s32 %s1536_s14, %s1658_s10  ;;  %s294_s26 = int_to_ptr.hbm [resolvable:$true] %s293_s26 }
  0x18   : > { %1282 = dma.hbm_to_vmem [thread:$0]  (!%p1277_p10), %s294_s26, 512, %s296_s30, [#allocation7], %s1994_s27, %s1994_s27, %s1995_s28  }
  0x19   : > { %p42_p12 = scmp.ne.s32.totalorder %s1532_s13, %s1528_s12  ;;  %p33_p13 = scmp.eq.s32.totalorder %s32_s18, 0 }
  0x1a   : > { %p43_p0 = scmp.eq.s32.totalorder %s1536_s14, 0  ;;  %p1293_p5 = scmp.lt.s32.totalorder %s1536_s14, 2 }
  0x1b   : > { %p1668_p3 = por %p229_p2, %p42_p12  ;;  %s318_s22 = sand.u32 1, %s1532_s13  }
  0x1c   : > { %s1674_s20 = scalar_select %p33_p13, %s1532_s13, %s35_s15  }
  0x1d   : > { %p44_p7 = por %p43_p0, %p42_p12  ;;  %s1223_s23 = sshll.u32 %s318_s22, 6 }
  0x1e   : > { %s1255_s24 = sshll.u32 %s1536_s14, 6  ;;  %s322_s30 = scalar_lea.vmem [#allocation3], %s1223_s23 }
  0x1f   : > { %s327_s29 = scalar_lea.hbm %s1984_s0, %s1255_s24  ;;  %s330_s27 = sshll.u32 %s322_s30, 4  ;;  %s331_s27 = int_to_ptr.vmem [resolvable:$true] %s330_s27 }
  0x20   : > { %s328_s18 = sshll.u32 %s327_s29, 4  ;;  %p1681_p2 = pnand %p1293_p5, %p44_p7  ;;  %s329_s18 = int_to_ptr.hbm [resolvable:$true] %s328_s18 }
  0x21   : > { %s319_s15 = scalar_lea.sflag [#allocation4], %s318_s22  ;;  %s1436_s3 = sshra.s32 %s329_s18, 4  ;;  %s1437_s3 = int_to_ptr.hbm [resolvable:$true] %s1436_s3 }
  0x22   : > { %s1438_s4 = scalar_lea.hbm %s1437_s3, 64  ;;  %p1440_p10 = pneg %p1681_p2 }
  0x23   : > { %p1439_p9 = scmp.ne.s32.totalorder %s1437_s3, %s1438_s4  ;;  %s1443_s25 = scalar_lea.hbm %s1984_s0, 128 }
  0x24   : > { %p1444_p0 = scmp.lt.s32.totalorder %s1437_s3, %s1984_s0  ;;  %p1445_p5 = scmp.lt.s32.totalorder %s1443_s25, %s1438_s4 }
  0x25   : > { %p1441_p12 = pnand %p1440_p10, %p1439_p9 }
  0x26   : > { %p1446_p7 = por %p1445_p5, %p1444_p0 }
  0x27   : > { %p1442_p13 = pneg %p1441_p12 }
  0x29   : > { %p1447_p11 = pnand %p1446_p7, %p1442_p13 }
  0x2b   : > { %1450 = shalt.err (!%p1447_p11)
}
  0x2c   : > { %s2005_s22 = smov 8   ;;  %s2006_s30 = smov 128  }
  0x2d   : > { %1286 = dma.hbm_to_vmem [thread:$0]  (!%p1681_p2), %s329_s18, 1024, %s331_s27, %s319_s15, %s2006_s30, %s2006_s30, %s2005_s22  }
  0x2e   : > { %356 = sbr.rel (%p1639_p8) target bundleno = 1053 (0x41d), region = 52  ;;  %s1701_s24 = sand.u32 (!%p1639_p8), 1, %s1528_s12  }
  0x2f   : > { %s1227_s3 = sshll.u32 (!%p1639_p8), %s1701_s24, 6  ;;  %s359_s4 = scalar_lea.sflag (!%p1639_p8), [#allocation4], %s1701_s24 }
  0x30   : > { %s1705_s23 = scalar_lea.vmem (!%p1639_p8), [#allocation3], %s1227_s3 }
  0x33   : > { %1511 = dma.done.wait (%p1626_p4), %s359_s4, 1024  }
  0x34   : > { %1513 = vsyncadd (%p1626_p4), %s359_s4, 4294966272 }
  0x35   : > { %1515 = dma.done.wait (%p49_p1), [#allocation7], 1024  }
  0x36   : > { %1517 = vsyncadd (%p49_p1), [#allocation7], 4294966272  ;;  %p421_p8 = scmp.lt.s32.totalorder %s1617_s7, 1  ;;  %v648_v0 = vlaneseq  ;;  %v444_v2 = vld [vmem:[#allocation6 + $0x18] sm:$0xff]  ;;  %v443_v4 = vld [vmem:[#allocation6 + $0x10] sm:$0xff]  ;;  %vm445_vm0 = vcmask 261120  }
  0x37   : > { %v515_v3 = vld [vmem:[#allocation8 + $0x18] sm:$0xff]  ;;  %482 = vmatpush.msra.mxu0 %v444_v2  ;;  %1256 = vmatpush.msra.mxu2 %v444_v2  ;;  %v514_v5 = vld [vmem:[#allocation8 + $0x10] sm:$0xff]  ;;  %v442_v6 = vld [vmem:[#allocation6 + $0x8] sm:$0xff]  ;;  %s619_s4 = sld [smem:[#allocation2]]  ;;  %vm761_vm1 = vcmask 1041409   ;;  %vm763_vm2 = vcmask 1042434  }
  0x38   : > { %s422_s21 = scalar_select %p421_p8, %s1617_s7, 1  ;;  %v649_v1 = vshrl.u32 %v648_v0, 7  ;;  %1257 = vmatpush.msra.mxu3 %v444_v2  ;;  %535 = vmatpush.msra.mxu1 %v515_v3  ;;  %v513_v7 = vld [vmem:[#allocation8 + $0x8] sm:$0xff]  ;;  %v441_v8 = vld [vmem:[#allocation6] sm:$0xff]  ;;  %v1732_v12 = vld [vmem:[%s1705_s23 + $0x10] sm:$0xff]  ;;  %vm765_vm3 = vcmask 1043459  }
  0x39   : > { %483 = vmatpush.msra.mxu0 %v443_v4  ;;  %1258 = vmatpush.msra.mxu2 %v443_v4  ;;  %v512_v10 = vld [vmem:[#allocation8] sm:$0xff]  ;;  %v1735_v13 = vld [vmem:[%s1705_s23 + $0x28] sm:$0xff]  ;;  %v1748_v19 = vld [vmem:[%s1705_s23 + $0x18] sm:$0xff]  ;;  %vm767_vm4 = vcmask 1044484   ;;  %vm769_vm5 = vcmask 1045509   ;;  %vm771_vm6 = vcmask 1046534  }
  0x3a   : > { %1335 = vset.pattern.permute.xlu2 %v649_v1  ;;  %1334 = vset.pattern.permute.xlu1 %v649_v1  ;;  %s1718_s16 = sshll.u32 %s422_s21, 3  ;;  %v1729_v11 = vld [vmem:[%s1705_s23] sm:$0xff]  ;;  %v1745_v18 = vld [vmem:[%s1705_s23 + $0x8] sm:$0xff]  ;;  %v1751_v20 = vld [vmem:[%s1705_s23 + $0x30] sm:$0xff]  ;;  %vm773_vm7 = vcmask 1047559   ;;  %vm776_vm8 = vcmask 64512  }
  0x3b   : > { %1336 = vset.pattern.permute.xlu0 %v649_v1  ;;  %s424_s18 = scalar_lea.vmem %s1985_s1, %s1718_s16  ;;  %1259 = vmatpush.msra.mxu3 %v443_v4  ;;  %s428_s26 = scalar_lea.vmem %s1986_s2, %s1718_s16  ;;  %v1760_v23 = vld [vmem:[%s1705_s23 + $0x20] sm:$0xff]  ;;  %v1763_v24 = vld [vmem:[%s1705_s23 + $0x38] sm:$0xff] }
  0x3c   : > { %536 = vmatpush.msra.mxu1 %v514_v5  ;;  %v629_v9 = vld [vmem:[%s424_s18] sm:$0xff]  ;;  %484 = vmatpush.msra.mxu0 %v442_v6  ;;  %s432_s27 = scalar_lea.vmem %s1993_s9, %s1718_s16  ;;  %s1230_s16 = sshll.u32 %s1701_s24, 3 }
  0x3d   : > { %1260 = vmatpush.msra.mxu2 %v442_v6  ;;  %1261 = vmatpush.msra.mxu3 %v442_v6  ;;  %v511_v14 = vld [vmem:[%s428_s26] sm:$0xff]  ;;  %v654_v15 = vperm.slane %v629_v9, 1  ;;  %v647_v16 = vperm.slane %v629_v9, 0  ;;  %v661_v17 = vperm.slane %v629_v9, 2  ;;  %v668_v21 = vperm.slane %v629_v9, 3  ;;  %s1252_s28 = sshll.u32 %s1617_s7, 3 }
  0x3e   : > { %537 = vmatpush.msra.mxu1 %v513_v7  ;;  %485 = vmatpush.msra.mxu0 %v441_v8  ;;  %v675_v22 = vperm.slane %v629_v9, 4  ;;  %v682_v25 = vperm.slane %v629_v9, 5  ;;  %v689_v26 = vperm.slane %v629_v9, 6  ;;  %v696_v27 = vperm.slane %v629_v9, 7  ;;  %v1340_v28 = vld [vmem:[%s1989_s5] ss:$0 sm:$0xff]  ;;  %s1073_s25 = scalar_lea.hbm %s1992_s8, %s1252_s28 }
  0x3f   : > { %1262 = vmatpush.msra.mxu2 %v441_v8  ;;  %1263 = vmatpush.msra.mxu3 %v441_v8  ;;  %v1341_v48 = vld [vmem:[%s1990_s6] ss:$0 sm:$0xff]  ;;  %s413_s7 = scalar_lea.vmem [#allocation9], %s1230_s16  ;;  %s1077_s29 = sshll.u32 %s1073_s25, 4  ;;  %s1078_s29 = int_to_ptr.hbm [resolvable:$true] %s1077_s29 }
  0x40   : > { %538 = vmatpush.msra.mxu1 %v512_v10  ;;  %1234 = vmatmul.msk.f32.vlgmr.msra.gmra.mxu0 %vm445_vm0, %v1729_v11  ;;  %s1075_s26 = sshll.u32 %s413_s7, 4  ;;  %s1059_s22 = scalar_lea.sflag [#allocation5], %s1701_s24  ;;  %s1076_s26 = int_to_ptr.vmem [resolvable:$true] %s1075_s26 }
  0x41   : > { %1236 = vmatmul.msk.f32.vlgmr.msra.gmra.mxu2 %vm445_vm0, %v1732_v12  ;;  %1239 = vmatmul.msk.f32.vlgmr.msra.gmra.mxu3 %vm445_vm0, %v1735_v13  ;;  %s1480_s30 = sshra.s32 %s1078_s29, 4  ;;  %s1486_s21 = scalar_lea.hbm %s1992_s8, 16  ;;  %s1481_s30 = int_to_ptr.hbm [resolvable:$true] %s1480_s30 }
  0x42   : > { %1242 = vmatmul.msk.f32.vlgmr.msra.gmra.mxu1 %vm445_vm0, %v511_v14  ;;  %659 = vperm.xlu2 %1335, %v654_v15   ;;  %s1482_s3 = scalar_lea.hbm %s1481_s30, 8  ;;  %p1487_p2 = scmp.lt.s32.totalorder %s1481_s30, %s1992_s8 }
  0x43   : > { %652 = vperm.xlu1 %1334, %v647_v16   ;;  %666 = vperm.xlu0 %1336, %v661_v17   ;;  %p1483_p1 = scmp.ne.s32.totalorder %s1481_s30, %s1482_s3  ;;  %p1488_p9 = scmp.lt.s32.totalorder %s1486_s21, %s1482_s3 }
  0x45   : > { %p1484_p4 = pnand %p1483_p1, %p1668_p3  ;;  %p1489_p10 = por %p1488_p9, %p1487_p2 }
  0x47   : > { %p1485_p11 = pneg %p1484_p4 }
  0x48   : > { %1235 = vmatmul.msk.f32.gmra.mxu0 %vm445_vm0, %v1745_v18 }
  0x49   : > { %1237 = vmatmul.msk.f32.gmra.mxu2 %vm445_vm0, %v1748_v19  ;;  %1240 = vmatmul.msk.f32.gmra.mxu3 %vm445_vm0, %v1751_v20  ;;  %p1490_p12 = pnand %p1489_p10, %p1485_p11 }
  0x4a   : > { %673 = vperm.xlu2 %1335, %v668_v21  }
  0x4b   : > { %680 = vperm.xlu1 %1334, %v675_v22  }
  0x51   : > { %1238 = vmatmul.msk.f32.gmra.mxu2 %vm445_vm0, %v1760_v23  ;;  %1241 = vmatmul.msk.f32.gmra.mxu3 %vm445_vm0, %v1763_v24 }
  0x52   : > { %687 = vperm.xlu2 %1335, %v682_v25  }
  0x53   : > { %694 = vperm.xlu1 %1334, %v689_v26  }
  0x5a   : > { %701 = vperm.xlu2 %1335, %v696_v27  }
  0xbd   : > { %v487_v29 = vpop.f32.mrf.mxu0 }
  0xbf   : > { %v540_v30 = vpop.f32.mrf.mxu1 }
  0xc0   : > { %v541_v31 = vadd.f32 %v1340_v28, %v540_v30 }
  0xc2   : > { %v545_v32 = vrot.slane %v541_v31, 2  ;;  %v548_v33 = vrot.slane %v541_v31, 5  ;;  %v544_v34 = vrot.slane %v541_v31, 1  ;;  %v551_v35 = vperm.slane %v541_v31, 0 }
  0xc3   : > { %v546_v46 = vrot.slane %v541_v31, 3  ;;  %v549_v47 = vrot.slane %v541_v31, 6  ;;  %v547_v60 = vrot.slane %v541_v31, 4  ;;  %v550_v2 = vrot.slane %v541_v31, 7 }
  0xc4   : > { %v493_v36 = vpop.f32.mrf.mxu2  ;;  %v553_v37 = vperm.slane %v545_v32, 0  ;;  %v556_v38 = vperm.slane %v548_v33, 0  ;;  %v502_v39 = vpop.f32.mrf.mxu3  ;;  %v552_v40 = vperm.slane %v544_v34, 0  ;;  %v567_v41 = vadd.f32 %v551_v35, %v487_v29 }
  0xc5   : > { %v490_v44 = vpop.f32.mrf.mxu0  ;;  %v554_v49 = vperm.slane %v546_v46, 0  ;;  %v557_v54 = vperm.slane %v549_v47, 0  ;;  %v555_v4 = vperm.slane %v547_v60, 0  ;;  %v558_v10 = vperm.slane %v550_v2, 0  ;;  %v1783_v32 = vpop.permute.xlu2 %659 }
  0xc6   : > { %v569_v42 = vadd.f32 %v553_v37, %v493_v36  ;;  %v572_v43 = vadd.f32 %v556_v38, %v502_v39  ;;  %v568_v45 = vadd.f32 %v552_v40, %v490_v44  ;;  %1342 = vtanh.f32 %v567_v41  ;;  %v1785_v33 = vpop.permute.xlu1 %652  ;;  %v1793_v38 = vpop.permute.xlu0 %666 }
  0xc7   : > { %v1542_v34 = vmov 0   ;;  %v620_v40 = vstv %s619_s4 }
  0xc8   : > { %1344 = vtanh.f32 %v569_v42  ;;  %1337 = vset.pattern.permute.xlu1 %v1542_v34  ;;  %1338 = vset.pattern.permute.xlu2 %v1542_v34 }
  0xc9   : > { %1346 = vtanh.f32 %v572_v43  ;;  %1339 = vset.pattern.permute.xlu0 %v1542_v34 }
  0xca   : > { %1348 = vtanh.f32 %v568_v45 }
  0xcc   : > { %v496_v50 = vpop.f32.mrf.mxu2  ;;  %v1343_v51 = vpop.eup %1342 }
  0xcd   : > { %v570_v52 = vadd.f32 %v554_v49, %v496_v50  ;;  %v505_v53 = vpop.f32.mrf.mxu3  ;;  %v587_v56 = vmul.f32 %v1343_v51, %v1341_v48  ;;  %v1787_v35 = vpop.permute.xlu2 %673 }
  0xce   : > { %v1345_v55 = vpop.eup %1344  ;;  %v573_v58 = vadd.f32 %v557_v54, %v505_v53  ;;  %v1789_v36 = vpop.permute.xlu1 %680 }
  0xcf   : > { %v1347_v57 = vpop.eup %1346  ;;  %1350 = vtanh.f32 %v570_v52  ;;  %v589_v59 = vmul.f32 %v1345_v55, %v1341_v48  ;;  %v595_v61 = vsel %vm445_vm0, %v587_v56, 0.0 }
  0xd0   : > { %v592_v62 = vmul.f32 %v1347_v57, %v1341_v48  ;;  %v1349_v63 = vpop.eup %1348  ;;  %596 = vadd.xlane.f32.xlu0 %v595_v61  ;;  %1352 = vtanh.f32 %v573_v58 }
  0xd1   : > { %v601_v1 = vsel %vm445_vm0, %v589_v59, 0.0  ;;  %v588_v6 = vmul.f32 %v1349_v63, %v1341_v48 }
  0xd2   : > { %v610_v3 = vsel %vm445_vm0, %v592_v62, 0.0  ;;  %602 = vadd.xlane.f32.xlu1 %v601_v1 }
  0xd3   : > { %611 = vadd.xlane.f32.xlu2 %v610_v3  ;;  %v598_v16 = vsel %vm445_vm0, %v588_v6, 0.0 }
  0xd4   : > { %v499_v5 = vpop.f32.mrf.mxu2 }
  0xd5   : > { %v1351_v7 = vpop.eup %1350  ;;  %v571_v8 = vadd.f32 %v555_v4, %v499_v5  ;;  %v508_v9 = vpop.f32.mrf.mxu3 }
  0xd6   : > { %v590_v14 = vmul.f32 %v1351_v7, %v1341_v48  ;;  %v574_v15 = vadd.f32 %v558_v10, %v508_v9  ;;  %v1353_v21 = vpop.eup %1352  ;;  %v1791_v37 = vpop.permute.xlu2 %687 }
  0xd7   : > { %1354 = vtanh.f32 %v571_v8  ;;  %v593_v22 = vmul.f32 %v1353_v21, %v1341_v48  ;;  %v1795_v39 = vpop.permute.xlu1 %694 }
  0xd8   : > { %v604_v17 = vsel %vm445_vm0, %v590_v14, 0.0  ;;  %599 = vadd.xlane.f32.xlu0 %v598_v16  ;;  %1356 = vtanh.f32 %v574_v15 }
  0xd9   : > { %v613_v27 = vsel %vm445_vm0, %v593_v22, 0.0 }
  0xda   : > { %605 = vadd.xlane.f32.xlu1 %v604_v17  ;;  %v1829_v17 = vand.u32 127, %v648_v0 }
  0xdd   : > { %v1355_v25 = vpop.eup %1354 }
  0xde   : > { %v591_v26 = vmul.f32 %v1355_v25, %v1341_v48  ;;  %v1357_v29 = vpop.eup %1356  ;;  %v1797_v41 = vpop.permute.xlu2 %701 }
  0xdf   : > { %v594_v30 = vmul.f32 %v1357_v29, %v1341_v48 }
  0xe0   : > { %v607_v28 = vsel %vm445_vm0, %v591_v26, 0.0  ;;  %614 = vadd.xlane.f32.xlu0 %v613_v27 }
  0xe1   : > { %608 = vadd.xlane.f32.xlu2 %v607_v28  ;;  %v616_v31 = vsel %vm445_vm0, %v594_v30, 0.0 }
  0xe8   : > { %617 = vadd.xlane.f32.xlu0 %v616_v31 }
 0x143   : > { %v597_v42 = vpop.xlane.xlu0 %596 }
 0x144   : > { %v621_v43 = vadd.f32 %v620_v40, %v597_v42 }
 0x145   : > { %v603_v44 = vpop.xlane.xlu1 %602 }
 0x146   : > { %v1243_v45 = vclamps-f32 %v621_v43, 15.0  ;;  %v623_v47 = vadd.f32 %v620_v40, %v603_v44  ;;  %v612_v48 = vpop.xlane.xlu2 %611 }
 0x147   : > { %v626_v56 = vadd.f32 %v620_v40, %v612_v48 }
 0x148   : > { %v1800_v46 = vmul.f32 %v1243_v45, %v1785_v33  ;;  %v1245_v50 = vclamps-f32 %v623_v47, 15.0 }
 0x149   : > { %v1248_v62 = vclamps-f32 %v626_v56, 15.0 }
 0x14a   : > { %728 = vperm.xlu1 %1337, %v1800_v46   ;;  %v1804_v57 = vmul.f32 %v1245_v50, %v1793_v38 }
 0x14b   : > { %v600_v49 = vpop.xlane.xlu0 %599  ;;  %v1813_v2 = vmul.f32 %v1248_v62, %v1791_v37 }
 0x14c   : > { %v622_v51 = vadd.f32 %v620_v40, %v600_v49 }
 0x14d   : > { %v606_v52 = vpop.xlane.xlu1 %605 }
 0x14e   : > { %v624_v53 = vadd.f32 %v620_v40, %v606_v52  ;;  %v1244_v54 = vclamps-f32 %v622_v51, 15.0 }
 0x150   : > { %v1246_v55 = vclamps-f32 %v624_v53, 15.0  ;;  %v712_v58 = vmul.f32 %v1244_v54, %v1783_v32 }
 0x152   : > { %v1808_v59 = vmul.f32 %v1246_v55, %v1787_v35  ;;  %734 = vperm.xlu1 %1337, %v1804_v57   ;;  %731 = vperm.xlu2 %1338, %v712_v58  }
 0x153   : > { %v615_v60 = vpop.xlane.xlu0 %614 }
 0x154   : > { %737 = vperm.xlu0 %1339, %v1808_v59   ;;  %v609_v61 = vpop.xlane.xlu2 %608  ;;  %v627_v3 = vadd.f32 %v620_v40, %v615_v60 }
 0x155   : > { %v625_v63 = vadd.f32 %v620_v40, %v609_v61 }
 0x156   : > { %v1249_v6 = vclamps-f32 %v627_v3, 15.0 }
 0x157   : > { %v1247_v1 = vclamps-f32 %v625_v63, 15.0 }
 0x158   : > { %v1821_v9 = vmul.f32 %v1249_v6, %v1795_v39 }
 0x159   : > { %v1816_v4 = vmul.f32 %v1247_v1, %v1789_v36 }
 0x15a   : > { %743 = vperm.xlu1 %1337, %v1813_v2  }
 0x15b   : > { %740 = vperm.xlu2 %1338, %v1816_v4   ;;  %v618_v5 = vpop.xlane.xlu0 %617 }
 0x15c   : > { %v628_v7 = vadd.f32 %v620_v40, %v618_v5 }
 0x15e   : > { %v1250_v8 = vclamps-f32 %v628_v7, 15.0 }
 0x160   : > { %v1824_v10 = vmul.f32 %v1250_v8, %v1797_v41 }
 0x162   : > { %749 = vperm.xlu1 %1337, %v1824_v10  }
 0x163   : > { %746 = vperm.xlu2 %1338, %v1821_v9  }
 0x1ac   : > { %v732_v15 = vpop.permute.xlu2 %731 }
 0x1ad   : > { %v754_v27 = vperm.slane %v732_v15, %v1829_v17 }
 0x1b5   : > { %v741_v21 = vpop.permute.xlu2 %740 }
 0x1b6   : > { %v757_v40 = vperm.slane %v741_v21, %v1829_v17 }
 0x1bc   : > { %v729_v14 = vpop.permute.xlu1 %728 }
 0x1bd   : > { %v753_v22 = vperm.slane %v729_v14, %v1829_v17  ;;  %v747_v42 = vpop.permute.xlu2 %746 }
 0x1be   : > { %v759_v45 = vperm.slane %v747_v42, %v1829_v17 }
 0x1bf   : > { %v762_v28 = vsel %vm761_vm1, %v754_v27, %v753_v22 }
 0x1c4   : > { %v735_v16 = vpop.permute.xlu1 %734 }
 0x1c5   : > { %v755_v25 = vperm.slane %v735_v16, %v1829_v17 }
 0x1c6   : > { %v738_v26 = vpop.permute.xlu0 %737 }
 0x1c7   : > { %v756_v29 = vperm.slane %v738_v26, %v1829_v17  ;;  %v764_v30 = vsel %vm763_vm2, %v755_v25, %v762_v28 }
 0x1c9   : > { %v766_v0 = vsel %vm765_vm3, %v756_v29, %v764_v30 }
 0x1ca   : > { %v768_v43 = vsel %vm767_vm4, %v757_v40, %v766_v0 }
 0x1cc   : > { %v744_v31 = vpop.permute.xlu1 %743 }
 0x1cd   : > { %v758_v34 = vperm.slane %v744_v31, %v1829_v17 }
 0x1cf   : > { %v770_v44 = vsel %vm769_vm5, %v758_v34, %v768_v43 }
 0x1d0   : > { %v772_v49 = vsel %vm771_vm6, %v759_v45, %v770_v44 }
 0x1d4   : > { %v750_v47 = vpop.permute.xlu1 %749 }
 0x1d5   : > { %v760_v48 = vperm.slane %v750_v47, %v1829_v17 }
 0x1d7   : > { %v774_v50 = vsel %vm773_vm7, %v760_v48, %v772_v49 }
 0x1d8   : > { %v777_v51 = vsel %vm776_vm8, %v774_v50, -inf }
 0x1d9   : > { %778 = vmax.xlane.f32.xlu0 %v777_v51 }
 0x24c   : > { %v779_v52 = vpop.xlane.xlu0 %778 }
 0x24d   : > { %v782_v53 = vperm.slane %v779_v52, 1  ;;  %v781_v54 = vperm.slane %v779_v52, 0  ;;  %v784_v55 = vperm.slane %v779_v52, 3  ;;  %v783_v56 = vperm.slane %v779_v52, 2 }
 0x24e   : > { %v786_v6 = vperm.slane %v779_v52, 5  ;;  %v785_v8 = vperm.slane %v779_v52, 4  ;;  %v788_v21 = vperm.slane %v779_v52, 7  ;;  %v787_v25 = vperm.slane %v779_v52, 6 }
 0x24f   : > { %v798_v60 = vsub.f32 %v712_v58, %v782_v53  ;;  %v797_v61 = vsub.f32 %v1800_v46, %v781_v54  ;;  %v800_v1 = vsub.f32 %v1808_v59, %v784_v55  ;;  %v799_v3 = vsub.f32 %v1804_v57, %v783_v56 }
 0x250   : > { %v802_v15 = vsub.f32 %v1813_v2, %v786_v6  ;;  %v801_v46 = vsub.f32 %v1816_v4, %v785_v8 }
 0x251   : > { %v807_v62 = vmul.f32 1.442695, %v798_v60  ;;  %v805_v63 = vmul.f32 1.442695, %v797_v61  ;;  %v811_v5 = vmul.f32 1.442695, %v800_v1 }
 0x252   : > { %v809_v7 = vmul.f32 1.442695, %v799_v3  ;;  %v815_v57 = vmul.f32 1.442695, %v802_v15  ;;  %v813_v22 = vmul.f32 1.442695, %v801_v46 }
 0x253   : > { %1358 = vpow2.f32 %v807_v62 }
 0x254   : > { %1360 = vpow2.f32 %v805_v63 }
 0x255   : > { %1362 = vpow2.f32 %v811_v5 }
 0x256   : > { %1364 = vpow2.f32 %v809_v7 }
 0x257   : > { %1366 = vpow2.f32 %v815_v57 }
 0x258   : > { %1368 = vpow2.f32 %v813_v22 }
 0x259   : > { %v1359_v14 = vpop.eup %1358 }
 0x25a   : > { %v1361_v16 = vpop.eup %1360  ;;  %v1852_v58 = vmul.f32 %v1359_v14, %v1783_v32  ;;  %v804_v32 = vsub.f32 %v1824_v10, %v788_v21 }
 0x25b   : > { %v1856_v59 = vmul.f32 %v1361_v16, %v1785_v33  ;;  %v1363_v26 = vpop.eup %1362  ;;  %v803_v33 = vsub.f32 %v1821_v9, %v787_v25 }
 0x25c   : > { %841 = vperm.xlu1 %1337, %v1852_v58   ;;  %v1365_v2 = vpop.eup %1364  ;;  %v1862_v27 = vmul.f32 %v1363_v26, %v1787_v35  ;;  %v819_v28 = vmul.f32 1.442695, %v804_v32 }
 0x25d   : > { %838 = vperm.xlu2 %1338, %v1856_v59   ;;  %v1866_v4 = vmul.f32 %v1365_v2, %v1793_v38  ;;  %v817_v29 = vmul.f32 1.442695, %v803_v33  ;;  %v1367_v30 = vpop.eup %1366 }
 0x25e   : > { %v1369_v31 = vpop.eup %1368  ;;  %1370 = vpow2.f32 %v819_v28  ;;  %v826_v10 = vmul.f32 %v1367_v30, %v1791_v37 }
 0x25f   : > { %1372 = vpow2.f32 %v817_v29  ;;  %v1872_v35 = vmul.f32 %v1369_v31, %v1789_v36 }
 0x264   : > { %847 = vperm.xlu1 %1337, %v1862_v27   ;;  %v1371_v38 = vpop.eup %1370 }
 0x265   : > { %844 = vperm.xlu2 %1338, %v1866_v4   ;;  %v1373_v9 = vpop.eup %1372  ;;  %v828_v0 = vmul.f32 %v1371_v38, %v1797_v41 }
 0x266   : > { %v1877_v34 = vmul.f32 %v1373_v9, %v1795_v39 }
 0x26c   : > { %853 = vperm.xlu1 %1337, %v826_v10  }
 0x26d   : > { %850 = vperm.xlu2 %1338, %v1872_v35  }
 0x274   : > { %859 = vperm.xlu1 %1337, %v828_v0  }
 0x275   : > { %856 = vperm.xlu2 %1338, %v1877_v34  }
 0x2b7   : > { %v839_v40 = vpop.permute.xlu2 %838 }
 0x2b8   : > { %v861_v45 = vperm.slane %v839_v40, %v1829_v17 }
 0x2bf   : > { %v845_v37 = vpop.permute.xlu2 %844 }
 0x2c0   : > { %v863_v41 = vperm.slane %v845_v37, %v1829_v17 }
 0x2c7   : > { %v851_v44 = vpop.permute.xlu2 %850 }
 0x2c8   : > { %v865_v52 = vperm.slane %v851_v44, %v1829_v17 }
 0x2ce   : > { %v842_v42 = vpop.permute.xlu1 %841 }
 0x2cf   : > { %v862_v36 = vperm.slane %v842_v42, %v1829_v17  ;;  %v857_v53 = vpop.permute.xlu2 %856 }
 0x2d0   : > { %v867_v56 = vperm.slane %v857_v53, %v1829_v17 }
 0x2d1   : > { %v869_v47 = vsel %vm761_vm1, %v862_v36, %v861_v45 }
 0x2d2   : > { %v870_v49 = vsel %vm763_vm2, %v863_v41, %v869_v47 }
 0x2d6   : > { %v848_v43 = vpop.permute.xlu1 %847 }
 0x2d7   : > { %v864_v48 = vperm.slane %v848_v43, %v1829_v17 }
 0x2d9   : > { %v871_v50 = vsel %vm765_vm3, %v864_v48, %v870_v49 }
 0x2da   : > { %v872_v54 = vsel %vm767_vm4, %v865_v52, %v871_v50 }
 0x2de   : > { %v854_v39 = vpop.permute.xlu1 %853 }
 0x2df   : > { %v866_v51 = vperm.slane %v854_v39, %v1829_v17 }
 0x2e1   : > { %v873_v55 = vsel %vm769_vm5, %v866_v51, %v872_v54 }
 0x2e2   : > { %v874_v62 = vsel %vm771_vm6, %v867_v56, %v873_v55 }
 0x2e6   : > { %v860_v60 = vpop.permute.xlu1 %859 }
 0x2e7   : > { %v868_v61 = vperm.slane %v860_v60, %v1829_v17 }
 0x2e9   : > { %v875_v63 = vsel %vm773_vm7, %v868_v61, %v874_v62 }
 0x2ea   : > { %v877_v1 = vsel %vm776_vm8, %v875_v63, 0.0 }
 0x2eb   : > { %878 = vadd.xlane.f32.xlu2 %v877_v1 }
 0x35e   : > { %v879_v3 = vpop.xlane.xlu2 %878 }
 0x35f   : > { %v880_v5 = vadd.f32 1e-06, %v879_v3 }
 0x361   : > { %1374 = vrcp.f32 %v880_v5  ;;  %v892_v14 = vand.u32 2147483648, %v880_v5  ;;  %v890_v16 = vand.u32 2147483647, %v880_v5  ;;  %vm886_vm10 = vweird.f32 %v880_v5 }
 0x363   : > { %v893_v57 = vor.u32 1.1754944e-38, %v892_v14  ;;  %vm891_vm12 = vcmp.eq.f32.partialorder %v890_v16, 8.507059e+37 }
 0x367   : > { %v1375_v6 = vpop.eup %1374 }
 0x368   : > { %v882_v7 = vmul.f32 %v1375_v6, %v880_v5  ;;  %vm887_vm9 = vweird.f32 %v1375_v6 }
 0x369   : > { %vm888_vm11 = vmor %vm886_vm10, %vm887_vm9 }
 0x36a   : > { %v883_v8 = vsub.f32 1.0, %v882_v7 }
 0x36c   : > { %v884_v15 = vmul.f32 %v1375_v6, %v883_v8 }
 0x36e   : > { %v885_v46 = vadd.f32 %v1375_v6, %v884_v15 }
 0x370   : > { %v889_v21 = vsel %vm888_vm11, %v1375_v6, %v885_v46 }
 0x371   : > { %v894_v22 = vsel %vm891_vm12, %v893_v57, %v889_v21 }
 0x372   : > { %v898_v25 = vperm.slane %v894_v22, 2  ;;  %v896_v26 = vperm.slane %v894_v22, 0  ;;  %v901_v33 = vperm.slane %v894_v22, 5  ;;  %v897_v28 = vperm.slane %v894_v22, 1 }
 0x373   : > { %v903_v31 = vperm.slane %v894_v22, 7  ;;  %v899_v38 = vperm.slane %v894_v22, 3  ;;  %v900_v42 = vperm.slane %v894_v22, 4 }
 0x374   : > { %v914_v2 = vmul.f32 %v898_v25, %v1866_v4  ;;  %v912_v32 = vmul.f32 %v896_v26, %v1856_v59  ;;  %v917_v29 = vmul.f32 %v901_v33, %v826_v10  ;;  %v913_v30 = vmul.f32 %v897_v28, %v1852_v58 }
 0x375   : > { %v919_v9 = vmul.f32 %v903_v31, %v828_v0  ;;  %v915_v40 = vmul.f32 %v899_v38, %v1862_v27  ;;  %v916_v4 = vmul.f32 %v900_v42, %v1872_v35  ;;  %v902_v59 = vperm.slane %v894_v22, 6 }
 0x376   : > { %932 = vperm.xlu0 %1339, %v914_v2   ;;  %922 = vperm.xlu1 %1337, %v912_v32  }
 0x377   : > { %v918_v37 = vmul.f32 %v902_v59, %v1877_v34 }
 0x37e   : > { %947 = vperm.xlu0 %1339, %v917_v29   ;;  %927 = vperm.xlu1 %1337, %v913_v30  }
 0x386   : > { %957 = vperm.xlu0 %1339, %v919_v9   ;;  %937 = vperm.xlu1 %1337, %v915_v40  }
 0x38e   : > { %942 = vperm.xlu1 %1337, %v916_v4  }
 0x396   : > { %952 = vperm.xlu1 %1337, %v918_v37  }
 0x3e8   : > { %v933_v10 = vpop.permute.xlu0 %932  ;;  %v923_v43 = vpop.permute.xlu1 %922 }
 0x3e9   : > { %v960_v0 = vmul.f32 %v923_v43, %v1729_v11  ;;  %v962_v45 = vmul.f32 %v933_v10, %v1732_v12 }
 0x3eb   : > { %v968_v35 = vsel %vm445_vm0, %v960_v0, 0.0  ;;  %v982_v34 = vsel %vm445_vm0, %v962_v45, 0.0 }
 0x3ec   : > { %v969_v41 = vrot.slane %v968_v35, 4  ;;  %v983_v51 = vrot.slane %v982_v34, 4 }
 0x3ee   : > { %v970_v53 = vadd.f32 %v969_v41, %v968_v35  ;;  %v984_v61 = vadd.f32 %v983_v51, %v982_v34 }
 0x3f0   : > { %v1902_v58 = vpop.permute.xlu0 %947  ;;  %v928_v44 = vpop.permute.xlu1 %927  ;;  %v971_v63 = vrot.slane %v970_v53, 2  ;;  %v985_v46 = vrot.slane %v984_v61, 2 }
 0x3f1   : > { %v961_v36 = vmul.f32 %v928_v44, %v1745_v18  ;;  %v965_v50 = vmul.f32 %v1902_v58, %v1735_v13  ;;  %v1042_v56 = vperm.slane %v928_v44, %v1829_v17  ;;  %v1046_v30 = vperm.slane %v1902_v58, %v1829_v17 }
 0x3f2   : > { %v972_v21 = vadd.f32 %v971_v63, %v970_v53  ;;  %v986_v29 = vadd.f32 %v985_v46, %v984_v61 }
 0x3f3   : > { %v975_v27 = vsel %vm445_vm0, %v961_v36, 0.0  ;;  %v1003_v54 = vsel %vm445_vm0, %v965_v50, 0.0 }
 0x3f4   : > { %v976_v47 = vrot.slane %v975_v27, 4  ;;  %v1004_v1 = vrot.slane %v1003_v54, 4  ;;  %v973_v9 = vrot.slane %v972_v21, 1  ;;  %v987_v0 = vrot.slane %v986_v29, 1 }
 0x3f6   : > { %v977_v18 = vadd.f32 %v976_v47, %v975_v27  ;;  %v1005_v22 = vadd.f32 %v1004_v1, %v1003_v54  ;;  %v974_v47 = vadd.f32 %v973_v9, %v972_v21 }
 0x3f8   : > { %v938_v48 = vpop.permute.xlu1 %937  ;;  %v958_v39 = vpop.permute.xlu0 %957  ;;  %v978_v55 = vrot.slane %v977_v18, 2  ;;  %v1006_v40 = vrot.slane %v1005_v22, 2 }
 0x3f9   : > { %v963_v49 = vmul.f32 %v938_v48, %v1748_v19  ;;  %v967_v52 = vmul.f32 %v958_v39, %v1763_v24  ;;  %v1041_v19 = vperm.slane %v923_v43, %v1829_v17  ;;  %v1043_v24 = vperm.slane %v933_v10, %v1829_v17 }
 0x3fa   : > { %v979_v5 = vadd.f32 %v978_v55, %v977_v18  ;;  %v1044_v7 = vperm.slane %v938_v48, %v1829_v17  ;;  %v1048_v37 = vperm.slane %v958_v39, %v1829_v17  ;;  %v1007_v48 = vadd.f32 %v1006_v40, %v1005_v22 }
 0x3fb   : > { %v989_v11 = vsel %vm445_vm0, %v963_v49, 0.0  ;;  %v1017_v62 = vsel %vm445_vm0, %v967_v52, 0.0  ;;  %v1049_v6 = vsel %vm761_vm1, %v1042_v56, %v1041_v19  ;;  %v988_v49 = vadd.f32 %v987_v0, %v986_v29 }
 0x3fc   : > { %v990_v12 = vrot.slane %v989_v11, 4  ;;  %v1018_v8 = vrot.slane %v1017_v62, 4  ;;  %v980_v25 = vrot.slane %v979_v5, 1 }
 0x3fe   : > { %v991_v60 = vadd.f32 %v990_v12, %v989_v11  ;;  %v1019_v32 = vadd.f32 %v1018_v8, %v1017_v62  ;;  %v981_v59 = vadd.f32 %v980_v25, %v979_v5  ;;  %v1008_v11 = vrot.slane %v1007_v48, 1 }
 0x400   : > { %v943_v13 = vpop.permute.xlu1 %942  ;;  %v992_v14 = vrot.slane %v991_v60, 2  ;;  %v1020_v58 = vrot.slane %v1019_v32, 2  ;;  %v1032_v34 = vsel %vm761_vm1, %v981_v59, %v974_v47  ;;  %v1009_v56 = vadd.f32 %v1008_v11, %v1007_v48 }
 0x401   : > { %v964_v3 = vmul.f32 %v943_v13, %v1760_v23  ;;  %v1045_v16 = vperm.slane %v943_v13, %v1829_v17  ;;  %v1050_v23 = vsel %vm763_vm2, %v1043_v24, %v1049_v6  ;;  %v1033_v51 = vsel %vm763_vm2, %v988_v49, %v1032_v34 }
 0x402   : > { %v1051_v26 = vsel %vm765_vm3, %v1044_v7, %v1050_v23  ;;  %v993_v33 = vadd.f32 %v992_v14, %v991_v60  ;;  %v1021_v41 = vadd.f32 %v1020_v58, %v1019_v32 }
 0x403   : > { %v996_v15 = vsel %vm445_vm0, %v964_v3, 0.0  ;;  %v1052_v28 = vsel %vm767_vm4, %v1045_v16, %v1051_v26 }
 0x404   : > { %v997_v57 = vrot.slane %v996_v15, 4  ;;  %v1053_v43 = vsel %vm769_vm5, %v1046_v30, %v1052_v28  ;;  %v994_v44 = vrot.slane %v993_v33, 1  ;;  %v1022_v12 = vrot.slane %v1021_v41, 1 }
 0x406   : > { %v998_v2 = vadd.f32 %v997_v57, %v996_v15  ;;  %v995_v39 = vadd.f32 %v994_v44, %v993_v33  ;;  %v1023_v61 = vadd.f32 %v1022_v12, %v1021_v41 }
 0x408   : > { %v999_v31 = vrot.slane %v998_v2, 2  ;;  %v953_v38 = vpop.permute.xlu1 %952  ;;  %v1034_v53 = vsel %vm765_vm3, %v995_v39, %v1033_v51 }
 0x409   : > { %v966_v42 = vmul.f32 %v953_v38, %v1751_v20  ;;  %v1047_v4 = vperm.slane %v953_v38, %v1829_v17 }
 0x40a   : > { %v1000_v10 = vadd.f32 %v999_v31, %v998_v2 }
 0x40b   : > { %v1010_v36 = vsel %vm445_vm0, %v966_v42, 0.0  ;;  %v1054_v20 = vsel %vm771_vm6, %v1047_v4, %v1053_v43 }
 0x40c   : > { %v1001_v27 = vrot.slane %v1000_v10, 1  ;;  %v1011_v45 = vrot.slane %v1010_v36, 4  ;;  %v1055_v35 = vsel %vm773_vm7, %v1048_v37, %v1054_v20 }
 0x40d   : > { %1057 = vst.msk [vmem:[%s432_s27] sm:$0xff] %vm776_vm8, %v1055_v35 }
 0x40e   : > { %v1012_v17 = vadd.f32 %v1011_v45, %v1010_v36  ;;  %v1002_v50 = vadd.f32 %v1001_v27, %v1000_v10 }
 0x410   : > { %v1013_v18 = vrot.slane %v1012_v17, 2  ;;  %v1035_v54 = vsel %vm767_vm4, %v1002_v50, %v1034_v53 }
 0x411   : > { %v1036_v19 = vsel %vm769_vm5, %v1009_v56, %v1035_v54 }
 0x412   : > { %v1014_v52 = vadd.f32 %v1013_v18, %v1012_v17 }
 0x414   : > { %v1015_v55 = vrot.slane %v1014_v52, 1 }
 0x416   : > { %v1016_v60 = vadd.f32 %v1015_v55, %v1014_v52 }
 0x418   : > { %v1037_v62 = vsel %vm771_vm6, %v1016_v60, %v1036_v19 }
 0x419   : > { %v1038_v13 = vsel %vm773_vm7, %v1023_v61, %v1037_v62 }
 0x41a   : > { %1040 = vst.msk [vmem:[%s413_s7] sm:$0xff] %vm445_vm0, %v1038_v13 }
 0x41b   : > { %1493 = shalt.err (!%p1490_p12)
}
 0x41c   : > { %1274 = dma.vmem_to_hbm [thread:$0]  (%p1668_p3), %s1076_s26, 128, %s1078_s29, %s1059_s22  }
 0x41d PF: > { %s1092_s24 = sand.u32 1, %s1524_s11   ;;  %p2007_p13 = scmp.ge.s32.totalorder %s1536_s14, 2 }
 0x41e   : > { %s1093_s28 = scalar_lea.sflag [#allocation5], %s1092_s24 }
 0x41f   : > { %p1288_p0 = pnand %p2007_p13, %p1631_p6 }
 0x421   : > { %p1289_p5 = pneg %p1288_p0 }
 0x423   : > { %1519 = dma.done.wait (%p1289_p5), %s1093_s28, 128  }
 0x424   : > { %1521 = vsyncadd (%p1289_p5), %s1093_s28, 4294967168  ;;  %p25_p7 = scmp.ge.s32.totalorder %s1658_s10, 4   ;;  %s2008_s11 = smov %s1528_s12 }
 0x425   : > { %s2009_s12 = smov %s1532_s13  ;;  %s2010_s13 = smov %s1674_s20 }
 0x426   : > { %s2011_s14 = smov %s1658_s10  ;;  %27 = sbr.rel (!%p25_p7) target bundleno = 10 (0xa), region = 123 }
 0x42b   :  { %1106 = vsyncpa [#allocation4], 1 }
 0x42c   :  { %1108 = vsyncpa [#allocation4 + $0x1], 1 }
 0x42d   :  { %1109 = vsyncpa [#allocation7], 1 }
 0x42e   :  { %1110 = vsyncpa [#allocation5], 1 }
 0x42f   :  { %1112 = vsyncpa [#allocation5 + $0x1], 1 }

</bundles_post_ra>
